<compile_context>
chip_gen: v7x
topology: tpu7x:2x2x1
jax: 0.10.0
libtpu: 0.0.40
codegen_flags: <defaults>
</compile_context>

<pallas_src>
import numpy as np
import jax
import jax.numpy as jnp
from jax.experimental import pallas as pl
from jax.experimental.pallas import tpu as pltpu

# Model dims (Conv2d(3,16,3,pad=1) -> ReLU -> MaxPool2d(2) -> Linear(256,10);
# fc size 16*4*4 implies an 8x8 spatial input).
N, C_IN, H, W = 2, 3, 8, 8
C_OUT = 16
K = 3
POOL = 2
HP, WP = H // POOL, W // POOL
FC_OUT = 10

HPAD = H + 2                        # padded rows per image
XCOLS = (W + 2) * C_IN + 2          # 30 data lanes + 1 "ones" lane + 1 pad = 32
ONES_COL = (W + 2) * C_IN           # lane that is constant 1.0 (carries conv bias)
CONVN = W * C_OUT                   # conv output lanes (w, c_out) = 128
PAIRW = (W - 1) * C_OUT             # lanes after w-pool pairing = 112

_VMEM = pl.BlockSpec(memory_space=pltpu.MemorySpace.VMEM)


def fused_kernel(xp_ref, wk_ref, wf_ref, bf_ref, o_ref):
    """conv(+bias)+ReLU -> 2x2 max-pool -> fc, all as values (no scratch)."""
    # 1) conv as 3 row-shifted matmuls (one per kh). Weights are Toeplitz over
    #    (w, kw) so the output is lane-dense: rows (n, h), lanes (w, c_out).
    #    The conv bias rides on the constant-1 input lane (wk[0] row ONES_COL).
    slabs = [
        jnp.concatenate(
            [xp_ref[pl.ds(n * HPAD + kh, H), :] for n in range(N)], axis=0)
        for kh in range(K)                                      # each [N*H, 32]
    ]
    acc = jnp.dot(slabs[0], wk_ref[0], preferred_element_type=jnp.float32)
    for kh in range(1, K):
        acc = acc + jnp.dot(slabs[kh], wk_ref[kh],
                            preferred_element_type=jnp.float32)
    y = jnp.maximum(acc, 0.0)                                   # [16, 128]

    # 2) 2x2 max pool.
    #    h-pool: sublane-only regroup + max over adjacent image rows.
    y2 = y.reshape(N * HP, POOL, CONVN)                         # [8, 2, 128]
    yh = jnp.maximum(y2[:, 0, :], y2[:, 1, :])                  # [8, 128]
    #    w-pool pairing: max of lane group w with group w+1 (16-lane shift);
    #    odd-w groups are discarded later via zero rows in the fc weight.
    m = jnp.maximum(yh[:, :PAIRW], yh[:, C_OUT:])               # [8, 112]

    # 3) fc: accumulate over hp (rows of m are (n, hp)). wf_ref[hp] has zero
    #    rows for odd w, which performs the pooling-window selection and the
    #    PyTorch (c, hp, wp) flatten order inside the matmul itself.
    m3 = m.reshape(N, HP, PAIRW)                                # [2, 4, 112]
    out = jnp.dot(m3[:, 0, :], wf_ref[0], preferred_element_type=jnp.float32)
    for hp in range(1, HP):
        out = out + jnp.dot(m3[:, hp, :], wf_ref[hp],
                            preferred_element_type=jnp.float32)
    o_ref[...] = out + bf_ref[...]                              # [2, 10]


def prepare_params(conv_w, conv_b, fc_w, fc_b):
    """One-time host-side weight relayout, hoisted out of the forward pass."""
    conv_w = np.asarray(conv_w, np.float32)     # [C_OUT, C_IN, K, K] (OIHW)
    conv_b = np.asarray(conv_b, np.float32)
    fc_w = np.asarray(fc_w, np.float32)         # [FC_OUT, C_OUT*HP*WP]
    fc_b = np.asarray(fc_b, np.float32)

    # Per-kh Toeplitz conv weight:
    #   wk[kh][wi*C_IN + c, w*C_OUT + co] = conv_w[co, c, kh, wi - w]
    # for 0 <= wi - w < K, else 0.
    wk = np.zeros((K, XCOLS, CONVN), np.float32)
    for kh in range(K):
        for kw in range(K):
            blk = conv_w[:, :, kh, kw].T                      # [C_IN, C_OUT]
            for w in range(W):
                wi = w + kw
                wk[kh, wi * C_IN:(wi + 1) * C_IN,
                   w * C_OUT:(w + 1) * C_OUT] = blk
    # conv bias rides on the constant-1 input lane; applied exactly once (kh=0).
    wk[0, ONES_COL, :] = np.tile(conv_b, W)

    # fc weight per hp over the w-paired lanes: only even-w rows are nonzero
    # (selects the stride-2 pooling windows) and they follow PyTorch's
    # (c_out, hp, wp) flatten order.
    wf = np.zeros((HP, PAIRW, FC_OUT), np.float32)
    for hp in range(HP):
        for wp in range(WP):
            for co in range(C_OUT):
                wf[hp, 2 * wp * C_OUT + co, :] = fc_w[:, co * HP * WP + hp * WP + wp]

    bf = fc_b.reshape(1, FC_OUT)
    return jnp.asarray(wk), jnp.asarray(wf), jnp.asarray(bf)


@jax.jit
def simple_conv_model(x, wk, wf, bf):
    # Tiny wrapper prep (~2.5 KiB): NCHW -> NHWC, pad=1, flatten lanes to
    # (w, c), append a constant-1 lane (folded conv bias) + one pad lane.
    xh = jnp.transpose(x, (0, 2, 3, 1))                               # [N, H, W, C_IN]
    xp = jnp.pad(xh, ((0, 0), (1, 1), (1, 1), (0, 0)))                # [N, H+2, W+2, C_IN]
    xp = xp.reshape(N, HPAD, (W + 2) * C_IN)
    xp = jnp.concatenate(
        [xp, jnp.ones((N, HPAD, 1), x.dtype), jnp.zeros((N, HPAD, 1), x.dtype)],
        axis=-1)                                                      # [N, H+2, 32]
    xp = xp.reshape(N * HPAD, XCOLS)                                  # [20, 32]

    return pl.pallas_call(
        fused_kernel,
        out_shape=jax.ShapeDtypeStruct((N, FC_OUT), jnp.float32),
        in_specs=[_VMEM] * 4,
        out_specs=_VMEM,
    )(xp, wk, wf, bf)


def _reference(x, conv_w, conv_b, fc_w, fc_b):
    y = jax.lax.conv_general_dilated(
        x, conv_w, window_strides=(1, 1), padding=((1, 1), (1, 1)),
        dimension_numbers=("NCHW", "OIHW", "NCHW"))
    y = y + conv_b.reshape(1, C_OUT, 1, 1)
    y = jnp.maximum(y, 0.0)
    y = y.reshape(N, C_OUT, HP, POOL, WP, POOL).max(axis=(3, 5))
    y = y.reshape(N, -1)
    return y @ fc_w.T + fc_b


if __name__ == "__main__":
    key = jax.random.PRNGKey(0)
    kx, kw1, kb1, kw2, kb2 = jax.random.split(key, 5)

    x = jax.random.normal(kx, (N, C_IN, H, W), dtype=jnp.float32)
    conv_w = 0.1 * jax.random.normal(kw1, (C_OUT, C_IN, K, K), dtype=jnp.float32)
    conv_b = 0.1 * jax.random.normal(kb1, (C_OUT,), dtype=jnp.float32)
    fc_w = 0.05 * jax.random.normal(kw2, (FC_OUT, C_OUT * HP * WP), dtype=jnp.float32)
    fc_b = 0.05 * jax.random.normal(kb2, (FC_OUT,), dtype=jnp.float32)

    # One-time weight preparation (outside the forward pass).
    wk, wf, bf = jax.block_until_ready(prepare_params(conv_w, conv_b, fc_w, fc_b))

    out = jax.block_until_ready(simple_conv_model(x, wk, wf, bf))

    ref = _reference(x, conv_w, conv_b, fc_w, fc_b)
    assert out.shape == (N, FC_OUT)
    assert jnp.allclose(out, ref, rtol=1e-4, atol=1e-4), "mismatch vs reference"

    print("KERNEL_OK")
</pallas_src>

<mosaic_0001>
module attributes {stable_mosaic.version = 11 : i64} {
  func.func @fused_kernel(%arg0: memref<20x32xf32, #tpu.memory_space<vmem>>, %arg1: memref<3x32x128xf32, #tpu.memory_space<vmem>>, %arg2: memref<4x112x10xf32, #tpu.memory_space<vmem>>, %arg3: memref<1x10xf32, #tpu.memory_space<vmem>>, %arg4: memref<2x10xf32, #tpu.memory_space<vmem>>) attributes {dimension_semantics = [], scalar_prefetch = 0 : i64, scratch_operands = 0 : i64, tpu.core_type = #tpu.core_type<tc>} {
    %c0 = arith.constant 0 : index
    %c0_0 = arith.constant 0 : index
    %0 = vector.load %arg0[%c0, %c0_0] : memref<20x32xf32, #tpu.memory_space<vmem>>, vector<8x32xf32>
    %c10 = arith.constant 10 : index
    %c0_1 = arith.constant 0 : index
    %1 = vector.load %arg0[%c10, %c0_1] : memref<20x32xf32, #tpu.memory_space<vmem>>, vector<8x32xf32>
    %2 = tpu.concatenate %0, %1 in 0 : vector<8x32xf32>, vector<8x32xf32> -> vector<16x32xf32>
    %c1 = arith.constant 1 : index
    %c0_2 = arith.constant 0 : index
    %3 = vector.load %arg0[%c1, %c0_2] : memref<20x32xf32, #tpu.memory_space<vmem>>, vector<8x32xf32>
    %c11 = arith.constant 11 : index
    %c0_3 = arith.constant 0 : index
    %4 = vector.load %arg0[%c11, %c0_3] : memref<20x32xf32, #tpu.memory_space<vmem>>, vector<8x32xf32>
    %5 = tpu.concatenate %3, %4 in 0 : vector<8x32xf32>, vector<8x32xf32> -> vector<16x32xf32>
    %c2 = arith.constant 2 : index
    %c0_4 = arith.constant 0 : index
    %6 = vector.load %arg0[%c2, %c0_4] : memref<20x32xf32, #tpu.memory_space<vmem>>, vector<8x32xf32>
    %c12 = arith.constant 12 : index
    %c0_5 = arith.constant 0 : index
    %7 = vector.load %arg0[%c12, %c0_5] : memref<20x32xf32, #tpu.memory_space<vmem>>, vector<8x32xf32>
    %8 = tpu.concatenate %6, %7 in 0 : vector<8x32xf32>, vector<8x32xf32> -> vector<16x32xf32>
    %c0_6 = arith.constant 0 : index
    %c0_7 = arith.constant 0 : index
    %c0_8 = arith.constant 0 : index
    %9 = vector.load %arg1[%c0_6, %c0_7, %c0_8] : memref<3x32x128xf32, #tpu.memory_space<vmem>>, vector<1x32x128xf32>
    %10 = vector.shape_cast %9 : vector<1x32x128xf32> to vector<32x128xf32>
    %cst = arith.constant dense<0.000000e+00> : vector<16x128xf32>
    %11 = tpu.matmul %2, %10, %cst {dimension_numbers = #tpu.dot_dimension_numbers<[1], [0], [0], [1], [0, 0, 1, 1], [], []>} : vector<16x32xf32>, vector<32x128xf32>, vector<16x128xf32> -> vector<16x128xf32>
    %c1_9 = arith.constant 1 : index
    %c0_10 = arith.constant 0 : index
    %c0_11 = arith.constant 0 : index
    %12 = vector.load %arg1[%c1_9, %c0_10, %c0_11] : memref<3x32x128xf32, #tpu.memory_space<vmem>>, vector<1x32x128xf32>
    %13 = vector.shape_cast %12 : vector<1x32x128xf32> to vector<32x128xf32>
    %cst_12 = arith.constant dense<0.000000e+00> : vector<16x128xf32>
    %14 = tpu.matmul %5, %13, %cst_12 {dimension_numbers = #tpu.dot_dimension_numbers<[1], [0], [0], [1], [0, 0, 1, 1], [], []>} : vector<16x32xf32>, vector<32x128xf32>, vector<16x128xf32> -> vector<16x128xf32>
    %15 = arith.addf %11, %14 : vector<16x128xf32>
    %c2_13 = arith.constant 2 : index
    %c0_14 = arith.constant 0 : index
    %c0_15 = arith.constant 0 : index
    %16 = vector.load %arg1[%c2_13, %c0_14, %c0_15] : memref<3x32x128xf32, #tpu.memory_space<vmem>>, vector<1x32x128xf32>
    %17 = vector.shape_cast %16 : vector<1x32x128xf32> to vector<32x128xf32>
    %cst_16 = arith.constant dense<0.000000e+00> : vector<16x128xf32>
    %18 = tpu.matmul %8, %17, %cst_16 {dimension_numbers = #tpu.dot_dimension_numbers<[1], [0], [0], [1], [0, 0, 1, 1], [], []>} : vector<16x32xf32>, vector<32x128xf32>, vector<16x128xf32> -> vector<16x128xf32>
    %19 = arith.addf %15, %18 : vector<16x128xf32>
    %cst_17 = arith.constant 0.000000e+00 : f32
    %20 = vector.broadcast %cst_17 : f32 to vector<16x128xf32>
    %21 = arith.maximumf %19, %20 : vector<16x128xf32>
    %22 = vector.shape_cast %21 : vector<16x128xf32> to vector<8x2x128xf32>
    %23 = vector.extract_strided_slice %22 {offsets = [0, 0, 0], sizes = [8, 1, 128], strides = [1, 1, 1]} : vector<8x2x128xf32> to vector<8x1x128xf32>
    %24 = vector.shape_cast %23 : vector<8x1x128xf32> to vector<8x128xf32>
    %25 = vector.extract_strided_slice %22 {offsets = [0, 1, 0], sizes = [8, 1, 128], strides = [1, 1, 1]} : vector<8x2x128xf32> to vector<8x1x128xf32>
    %26 = vector.shape_cast %25 : vector<8x1x128xf32> to vector<8x128xf32>
    %27 = arith.maximumf %24, %26 : vector<8x128xf32>
    %28 = vector.extract_strided_slice %27 {offsets = [0, 0], sizes = [8, 112], strides = [1, 1]} : vector<8x128xf32> to vector<8x112xf32>
    %29 = vector.extract_strided_slice %27 {offsets = [0, 16], sizes = [8, 112], strides = [1, 1]} : vector<8x128xf32> to vector<8x112xf32>
    %30 = arith.maximumf %28, %29 : vector<8x112xf32>
    %31 = vector.shape_cast %30 : vector<8x112xf32> to vector<2x4x112xf32>
    %32 = vector.extract_strided_slice %31 {offsets = [0, 0, 0], sizes = [2, 1, 112], strides = [1, 1, 1]} : vector<2x4x112xf32> to vector<2x1x112xf32>
    %33 = vector.shape_cast %32 : vector<2x1x112xf32> to vector<2x112xf32>
    %c0_18 = arith.constant 0 : index
    %c0_19 = arith.constant 0 : index
    %c0_20 = arith.constant 0 : index
    %34 = vector.load %arg2[%c0_18, %c0_19, %c0_20] : memref<4x112x10xf32, #tpu.memory_space<vmem>>, vector<1x112x10xf32>
    %35 = vector.shape_cast %34 : vector<1x112x10xf32> to vector<112x10xf32>
    %cst_21 = arith.constant dense<0.000000e+00> : vector<2x10xf32>
    %36 = tpu.matmul %33, %35, %cst_21 {dimension_numbers = #tpu.dot_dimension_numbers<[1], [0], [0], [1], [0, 0, 1, 1], [], []>} : vector<2x112xf32>, vector<112x10xf32>, vector<2x10xf32> -> vector<2x10xf32>
    %37 = vector.extract_strided_slice %31 {offsets = [0, 1, 0], sizes = [2, 1, 112], strides = [1, 1, 1]} : vector<2x4x112xf32> to vector<2x1x112xf32>
    %38 = vector.shape_cast %37 : vector<2x1x112xf32> to vector<2x112xf32>
    %c1_22 = arith.constant 1 : index
    %c0_23 = arith.constant 0 : index
    %c0_24 = arith.constant 0 : index
    %39 = vector.load %arg2[%c1_22, %c0_23, %c0_24] : memref<4x112x10xf32, #tpu.memory_space<vmem>>, vector<1x112x10xf32>
    %40 = vector.shape_cast %39 : vector<1x112x10xf32> to vector<112x10xf32>
    %cst_25 = arith.constant dense<0.000000e+00> : vector<2x10xf32>
    %41 = tpu.matmul %38, %40, %cst_25 {dimension_numbers = #tpu.dot_dimension_numbers<[1], [0], [0], [1], [0, 0, 1, 1], [], []>} : vector<2x112xf32>, vector<112x10xf32>, vector<2x10xf32> -> vector<2x10xf32>
    %42 = arith.addf %36, %41 : vector<2x10xf32>
    %43 = vector.extract_strided_slice %31 {offsets = [0, 2, 0], sizes = [2, 1, 112], strides = [1, 1, 1]} : vector<2x4x112xf32> to vector<2x1x112xf32>
    %44 = vector.shape_cast %43 : vector<2x1x112xf32> to vector<2x112xf32>
    %c2_26 = arith.constant 2 : index
    %c0_27 = arith.constant 0 : index
    %c0_28 = arith.constant 0 : index
    %45 = vector.load %arg2[%c2_26, %c0_27, %c0_28] : memref<4x112x10xf32, #tpu.memory_space<vmem>>, vector<1x112x10xf32>
    %46 = vector.shape_cast %45 : vector<1x112x10xf32> to vector<112x10xf32>
    %cst_29 = arith.constant dense<0.000000e+00> : vector<2x10xf32>
    %47 = tpu.matmul %44, %46, %cst_29 {dimension_numbers = #tpu.dot_dimension_numbers<[1], [0], [0], [1], [0, 0, 1, 1], [], []>} : vector<2x112xf32>, vector<112x10xf32>, vector<2x10xf32> -> vector<2x10xf32>
    %48 = arith.addf %42, %47 : vector<2x10xf32>
    %49 = vector.extract_strided_slice %31 {offsets = [0, 3, 0], sizes = [2, 1, 112], strides = [1, 1, 1]} : vector<2x4x112xf32> to vector<2x1x112xf32>
    %50 = vector.shape_cast %49 : vector<2x1x112xf32> to vector<2x112xf32>
    %c3 = arith.constant 3 : index
    %c0_30 = arith.constant 0 : index
    %c0_31 = arith.constant 0 : index
    %51 = vector.load %arg2[%c3, %c0_30, %c0_31] : memref<4x112x10xf32, #tpu.memory_space<vmem>>, vector<1x112x10xf32>
    %52 = vector.shape_cast %51 : vector<1x112x10xf32> to vector<112x10xf32>
    %cst_32 = arith.constant dense<0.000000e+00> : vector<2x10xf32>
    %53 = tpu.matmul %50, %52, %cst_32 {dimension_numbers = #tpu.dot_dimension_numbers<[1], [0], [0], [1], [0, 0, 1, 1], [], []>} : vector<2x112xf32>, vector<112x10xf32>, vector<2x10xf32> -> vector<2x10xf32>
    %54 = arith.addf %48, %53 : vector<2x10xf32>
    %c0_33 = arith.constant 0 : index
    %c0_34 = arith.constant 0 : index
    %55 = vector.load %arg3[%c0_33, %c0_34] : memref<1x10xf32, #tpu.memory_space<vmem>>, vector<1x10xf32>
    %56 = vector.broadcast %55 : vector<1x10xf32> to vector<2x10xf32>
    %57 = arith.addf %54, %56 : vector<2x10xf32>
    %c0_35 = arith.constant 0 : index
    %c0_36 = arith.constant 0 : index
    %58 = vector.load %arg4[%c0_35, %c0_36] : memref<2x10xf32, #tpu.memory_space<vmem>>, vector<2x10xf32>
    tpu.vector_store %arg4[%c0_35, %c0_36], %57 {strides = array<i32>} : memref<2x10xf32, #tpu.memory_space<vmem>>, vector<2x10xf32>,
    return
  }
}

</mosaic_0001>

<bundles_post_ra>
// kernel: simple_conv_model.1
= control target key start
LH: loop header
LB: loop body
LE: loop exit
PB: predicated region body
PF: predicated region fallthrough
CT: control target
= control target key end

     0   :  { %vm33_vm0 = vcmask 261120   ;;  %s1615_s0 = inlined_call_operand.vmem [shape: f32[20,32], index: 0, kind: input, shape index: {}]   ;;  %s1616_s1 = inlined_call_operand.vmem [shape: f32[3,32,128], index: 1, kind: input, shape index: {}]   ;;  %s1617_s2 = inlined_call_operand.vmem [shape: f32[4,112,10], index: 2, kind: input, shape index: {}]   ;;  %s1618_s3 = inlined_call_operand.vmem [shape: f32[1,10], index: 3, kind: input, shape index: {}]   ;;  %s1619_s4 = inlined_call_operand.hbm [shape: f32[2,10], index: 4, kind: output, shape index: {}]  }
   0x1   :  { %v24_v0 = vld [vmem:[%s1616_s1] sm:$0xff]  ;;  %v25_v1 = vld [vmem:[%s1616_s1 + $0x8] sm:$0xff]  ;;  %v26_v2 = vld [vmem:[%s1616_s1 + $0x10] sm:$0xff] }
   0x2   :  { %v1133_v3 = vpack.c.bf16 %v25_v1, %v24_v0  ;;  %v27_v4 = vld [vmem:[%s1616_s1 + $0x18] sm:$0xff]  ;;  %v18_v5 = vld [vmem:[%s1615_s0] sm:$0xff]  ;;  %v822_v8 = vld [vmem:[%s1616_s1 + $0x28] sm:$0xff] }
   0x3   :  { %v821_v6 = vld [vmem:[%s1616_s1 + $0x20] sm:$0xff]  ;;  %v1137_v7 = vpack.c.bf16 %v27_v4, %v26_v2  ;;  %987 = vmatprep.mubr.msk.f32.mxu0 %vm33_vm0, %v18_v5  ;;  %v830_v11 = vld [vmem:[%s1616_s1 + $0x48] sm:$0xff]  ;;  %v823_v12 = vld [vmem:[%s1616_s1 + $0x30] sm:$0xff] }
   0x4   :  { %v829_v9 = vld [vmem:[%s1616_s1 + $0x40] sm:$0xff]  ;;  %1134 = vmatprep.subr.bf16.mxu0 %v1133_v3  ;;  %v1125_v10 = vpack.c.bf16 %v822_v8, %v821_v6  ;;  %v824_v13 = vld [vmem:[%s1616_s1 + $0x38] sm:$0xff]  ;;  %v831_v17 = vld [vmem:[%s1616_s1 + $0x50] sm:$0xff] }
   0x5   :  { %1136 = vmatpush3.bf16.msra.mxu0 %v1133_v3  ;;  %v1129_v14 = vpack.c.bf16 %v824_v13, %v823_v12  ;;  %v20_v15 = vld [vmem:[%s1615_s0 + $0x1] sm:$0xff]  ;;  %v1141_v16 = vpack.c.bf16 %v830_v11, %v829_v9  ;;  %v832_v18 = vld [vmem:[%s1616_s1 + $0x58] sm:$0xff] }
   0x6   :  { %1138 = vmatprep.subr.bf16.mxu0 %v1137_v7  ;;  %1126 = vmatprep.subr.bf16.mxu1 %v1125_v10 }
   0x7   :  { %1128 = vmatpush3.bf16.msra.mxu1 %v1125_v10  ;;  %976 = vmatprep.mubr.msk.f32.mxu1 %vm33_vm0, %v20_v15 }
   0x8   :  { %9 = vsyncpa [#allocation3], 0  ;;  %1130 = vmatprep.subr.bf16.mxu1 %v1129_v14  ;;  %v19_v19 = vld [vmem:[%s1615_s0 + $0xa] sm:$0xff]  ;;  %v1145_v20 = vpack.c.bf16 %v832_v18, %v831_v17  ;;  %v22_v21 = vld [vmem:[%s1615_s0 + $0x2] sm:$0xff]  ;;  %v1267_v27 = vmov 0.0|0.0   ;;  %v292_v57 = vlaneseq  ;;  %vm1269_vm1 = vmmov 0  }
   0x9   :  { %1140 = vmatpush3.bf16.msra.mxu0 %v1137_v7  ;;  %v21_v22 = vld [vmem:[%s1615_s0 + $0xb] sm:$0xff]  ;;  %v402_v24 = vld [vmem:[%s1617_s2] sm:$0xff]  ;;  %v844_v29 = vld [vmem:[%s1617_s2 + $0x78] sm:$0xff]  ;;  %v1268_v55 = vmov 1983009808   ;;  %s1271_s24 = smov 112  }
   0xa   :  { %1142 = vmatprep.subr.bf16.mxu0 %v1141_v16  ;;  %v23_v23 = vld [vmem:[%s1615_s0 + $0xc] sm:$0xff]  ;;  %v405_v31 = vld [vmem:[%s1617_s2 + $0x18] sm:$0xff]  ;;  %v845_v33 = vld [vmem:[%s1617_s2 + $0x80] sm:$0xff]  ;;  %v290_v56 = vunpack.c.l.s4 %v1268_v55  ;;  %v1430_v61 = vshrl.u32 %v292_v57, 7  ;;  %vm441_vm2 = vcmask 1041409   ;;  %vm443_vm3 = vcmask 916480  }
   0xb   :  { %1132 = vmatpush3.bf16.msra.mxu1 %v1129_v14  ;;  %v403_v25 = vld [vmem:[%s1617_s2 + $0x8] sm:$0xff]  ;;  %v843_v26 = vld [vmem:[%s1617_s2 + $0x70] sm:$0xff]  ;;  %v406_v37 = vld [vmem:[%s1617_s2 + $0x20] sm:$0xff]  ;;  %s1272_s26 = smov [#allocation2]   ;;  %vm805_vm4 = vcmask 74752  }
   0xc   :  { %988 = vmatmul.mubr.msk.f32.vlgmr.msra.gmra.mrb[0].mxu0 %vm33_vm0, %v19_v19  ;;  %v1171_v28 = vpack.c.bf16 %v403_v25, %v402_v24  ;;  %1149 = vmatprep.subr.bf16.mxu1 %v1267_v27  ;;  %v404_v30 = vld [vmem:[%s1617_s2 + $0x10] sm:$0xff]  ;;  %v1150_v32 = vpack.c.bf16 %v844_v29, %v843_v26  ;;  %v846_v34 = vld [vmem:[%s1617_s2 + $0x88] sm:$0xff]  ;;  %v848_v40 = vld [vmem:[%s1617_s2 + $0x98] sm:$0xff]  ;;  %v291_v60 = vunpack.c.0.s8 %v290_v56  ;;  %s813_s27 = sshll.u32 %s1272_s26, 4  ;;  %s814_s27 = int_to_ptr.vmem [resolvable:$true] %s813_s27 }
   0xd   :  { %1144 = vmatpush3.bf16.msra.mxu0 %v1141_v16  ;;  %998 = vmatprep.mubr.msk.f32.mxu0 %vm33_vm0, %v22_v21  ;;  %v1174_v35 = vpack.c.bf16 %v405_v31, %v404_v30  ;;  %v1153_v36 = vpack.c.bf16 %v846_v34, %v845_v33  ;;  %v407_v38 = vld [vmem:[%s1617_s2 + $0x28] sm:$0xff]  ;;  %v847_v39 = vld [vmem:[%s1617_s2 + $0x90] sm:$0xff]  ;;  %v409_v44 = vld [vmem:[%s1617_s2 + $0x38] sm:$0xff]  ;;  %s1243_s28 = scalar_lea.vmem %s814_s27, 32  ;;  %p1248_p1 = scmp.lt.s32.totalorder %s814_s27, %s814_s27 }
   0xe   :  { %1146 = vmatprep.subr.bf16.mxu0 %v1145_v20  ;;  %977 = vmatmul.mubr.msk.f32.vlgmr.msra.gmra.mrb[0].mxu1 %vm33_vm0, %v21_v22  ;;  %v1177_v41 = vpack.c.bf16 %v407_v38, %v406_v37  ;;  %v1156_v42 = vpack.c.bf16 %v848_v40, %v847_v39  ;;  %v408_v43 = vld [vmem:[%s1617_s2 + $0x30] sm:$0xff]  ;;  %v849_v45 = vld [vmem:[%s1617_s2 + $0xa0] sm:$0xff]  ;;  %v850_v46 = vld [vmem:[%s1617_s2 + $0xa8] sm:$0xff]  ;;  %v294_v6 = vsub.s32 %v291_v60, %v1430_v61  ;;  %p1244_p0 = scmp.ne.s32.totalorder %s814_s27, %s1243_s28  ;;  %p1249_p2 = scmp.lt.s32.totalorder %s1243_s28, %s1243_s28 }
   0xf   :  { %1151 = vmatpush3.bf16.msra.mxu1 %v1150_v32  ;;  %v1180_v47 = vpack.c.bf16 %v409_v44, %v408_v43  ;;  %v1159_v48 = vpack.c.bf16 %v850_v46, %v849_v45  ;;  %v410_v49 = vld [vmem:[%s1617_s2 + $0x40] sm:$0xff]  ;;  %v411_v50 = vld [vmem:[%s1617_s2 + $0x48] sm:$0xff]  ;;  %v851_v51 = vld [vmem:[%s1617_s2 + $0xb0] sm:$0xff] }
  0x10   :  { %1152 = vmatprep.subr.bf16.mxu1 %v1267_v27  ;;  %v852_v52 = vld [vmem:[%s1617_s2 + $0xb8] sm:$0xff]  ;;  %v1183_v53 = vpack.c.bf16 %v411_v50, %v410_v49  ;;  %v412_v62 = vld [vmem:[%s1617_s2 + $0x50] sm:$0xff]  ;;  %v853_v1 = vld [vmem:[%s1617_s2 + $0xc0] sm:$0xff]  ;;  %p1250_p3 = por %p1249_p2, %p1248_p1 }
  0x11   :  { %1148 = vmatpush3.bf16.msra.mxu0 %v1145_v20  ;;  %v1162_v54 = vpack.c.bf16 %v852_v52, %v851_v51  ;;  %v413_v63 = vld [vmem:[%s1617_s2 + $0x58] sm:$0xff]  ;;  %v854_v2 = vld [vmem:[%s1617_s2 + $0xc8] sm:$0xff]  ;;  %v414_v8 = vld [vmem:[%s1617_s2 + $0x60] sm:$0xff]  ;;  %v1270_v20 = vmov 0.0  }
  0x12   :  { %1170 = vmatprep.subr.bf16.mxu0 %v1267_v27  ;;  %v1186_v0 = vpack.c.bf16 %v413_v63, %v412_v62  ;;  %v1165_v4 = vpack.c.bf16 %v854_v2, %v853_v1  ;;  %v415_v9 = vld [vmem:[%s1617_s2 + $0x68] sm:$0xff]  ;;  %v855_v13 = vld [vmem:[%s1617_s2 + $0xd0] sm:$0xff]  ;;  %v856_v14 = vld [vmem:[%s1617_s2 + $0xd8] sm:$0xff]  ;;  %1029 = vmatprep.mubr.msk.f32.mxu1 %vm1269_vm1, %v1270_v20  ;;  %p1251_p4 = pnand %p1250_p3, %p1244_p0 }
  0x13   :  { %1154 = vmatpush3.bf16.msra.mxu1 %v1153_v36  ;;  %v1189_v11 = vpack.c.bf16 %v415_v9, %v414_v8  ;;  %v1168_v16 = vpack.c.bf16 %v856_v14, %v855_v13  ;;  %v874_v50 = vld [vmem:[%s1617_s2 + $0x150] sm:$0xff]  ;;  %v875_v51 = vld [vmem:[%s1617_s2 + $0x158] sm:$0xff]  ;;  %v859_v55 = vld [vmem:[%s1617_s2 + $0xe0] sm:$0xff] }
  0x14   :  { %999 = vmatmul.mubr.msk.f32.vlgmr.msra.gmra.mrb[0].mxu0 %vm33_vm0, %v23_v23  ;;  %1155 = vmatprep.subr.bf16.mxu1 %v1267_v27  ;;  %v860_v56 = vld [vmem:[%s1617_s2 + $0xe8] sm:$0xff]  ;;  %v1213_v60 = vpack.c.bf16 %v875_v51, %v874_v50  ;;  %v879_v8 = vld [vmem:[%s1617_s2 + $0x178] sm:$0xff]  ;;  %v880_v13 = vld [vmem:[%s1617_s2 + $0x180] sm:$0xff] }
  0x15   :  { %1172 = vmatpush3.bf16.msra.mxu0 %v1171_v28  ;;  %1060 = vmatprep.mubr.msk.f32.mxu0 %vm1269_vm1, %v1270_v20  ;;  %v877_v62 = vld [vmem:[%s1617_s2 + $0x168] sm:$0xff]  ;;  %v1192_v2 = vpack.c.bf16 %v860_v56, %v859_v55 }
  0x16   :  { %1173 = vmatprep.subr.bf16.mxu0 %v1267_v27  ;;  %v881_v14 = vld [vmem:[%s1617_s2 + $0x188] sm:$0xff] }
  0x17   :  { %1157 = vmatpush3.bf16.msra.mxu1 %v1156_v42 }
  0x18   :  { %1158 = vmatprep.subr.bf16.mxu1 %v1267_v27 }
  0x19   :  { %1175 = vmatpush3.bf16.msra.mxu0 %v1174_v35 }
  0x1a   :  { %1176 = vmatprep.subr.bf16.mxu0 %v1267_v27 }
  0x1b   :  { %1160 = vmatpush3.bf16.msra.mxu1 %v1159_v48 }
  0x1c   :  { %1161 = vmatprep.subr.bf16.mxu1 %v1267_v27 }
  0x1d   :  { %1178 = vmatpush3.bf16.msra.mxu0 %v1177_v41 }
  0x1e   :  { %1179 = vmatprep.subr.bf16.mxu0 %v1267_v27 }
  0x1f   :  { %1163 = vmatpush3.bf16.msra.mxu1 %v1162_v54 }
  0x20   :  { %1164 = vmatprep.subr.bf16.mxu1 %v1267_v27 }
  0x21   :  { %1181 = vmatpush3.bf16.msra.mxu0 %v1180_v47  ;;  %v1478_v47 = vsub.s32 0, %v1430_v61  ;;  %v876_v61 = vld [vmem:[%s1617_s2 + $0x160] sm:$0xff] }
  0x22   :  { %1182 = vmatprep.subr.bf16.mxu0 %v1267_v27 }
  0x23   :  { %1166 = vmatpush3.bf16.msra.mxu1 %v1165_v4  ;;  %v862_v4 = vld [vmem:[%s1617_s2 + $0xf8] sm:$0xff] }
  0x24   :  { %1167 = vmatprep.subr.bf16.mxu1 %v1267_v27 }
  0x25   :  { %1184 = vmatpush3.bf16.msra.mxu0 %v1183_v53 }
  0x26   :  { %1185 = vmatprep.subr.bf16.mxu0 %v1267_v27 }
  0x27   :  { %1169 = vmatpush3.bf16.msra.mxu1 %v1168_v16  ;;  %v865_v16 = vld [vmem:[%s1617_s2 + $0x110] sm:$0xff] }
  0x28   :  { %1191 = vmatprep.subr.bf16.mxu1 %v1267_v27 }
  0x29   :  { %1187 = vmatpush3.bf16.msra.mxu0 %v1186_v0 }
  0x2a   :  { %1188 = vmatprep.subr.bf16.mxu0 %v1267_v27 }
  0x2d   :  { %1190 = vmatpush3.bf16.msra.mxu0 %v1189_v11  ;;  %v864_v11 = vld [vmem:[%s1617_s2 + $0x108] sm:$0xff] }
  0x2e   :  { %1212 = vmatprep.subr.bf16.mxu0 %v1267_v27 }
  0xe1   :  { %v978_v58 = vpop.f32.mrb[0].mxu1 }
  0xe2   :  { %v106_v59 = vpop.f32.mrb[1].mxu1 }
  0xe7   :  { %v1000_v3 = vpop.f32.mrb[0].mxu0 }
  0xe8   :  { %v1233_v5 = vadd.f32 %v1000_v3, %v978_v58  ;;  %v273_v7 = vpop.f32.mrb[1].mxu0  ;;  %v861_v3 = vld [vmem:[%s1617_s2 + $0xf0] sm:$0xff] }
  0xe9   :  { %v1234_v10 = vadd.f32 %v273_v7, %v106_v59  ;;  %v878_v7 = vld [vmem:[%s1617_s2 + $0x170] sm:$0xff]  ;;  %v1195_v9 = vpack.c.bf16 %v862_v4, %v861_v3 }
  0xea   :  { %v285_v12 = vmax.f32 %v1233_v5, 0.0 }
  0xeb   :  { %v284_v15 = vmax.f32 %v1234_v10, 0.0  ;;  %v863_v10 = vld [vmem:[%s1617_s2 + $0x100] sm:$0xff] }
  0xec   :  { %v312_v17 = vrot.slane %v285_v12, %v294_v6  ;;  %v305_v18 = vcombine.high %v285_v12, %v285_v12  ;;  %v1219_v12 = vpack.c.bf16 %v879_v8, %v878_v7 }
  0xed   :  { %v295_v19 = vrot.slane %v284_v15, %v294_v6  ;;  %v288_v21 = vcombine.high %v284_v15, %v284_v15  ;;  %v1198_v15 = vpack.c.bf16 %v864_v11, %v863_v10 }
  0xee   :  { %v320_v24 = vcombine.high %v312_v17, %v312_v17  ;;  %v319_v25 = vrot.slane %v305_v18, %v294_v6  ;;  %v839_v29 = vrot.slane %v312_v17, 9  ;;  %v1222_v18 = vpack.c.bf16 %v881_v14, %v880_v13 }
  0xef   :  { %v835_v22 = vrot.slane %v295_v19, 9  ;;  %v303_v23 = vcombine.high %v295_v19, %v295_v19  ;;  %v302_v30 = vrot.slane %v288_v21, %v294_v6  ;;  %v1216_v6 = vpack.c.bf16 %v877_v62, %v876_v61  ;;  %v883_v21 = vld [vmem:[%s1617_s2 + $0x198] sm:$0xff] }
  0xf0   :  { %v840_v32 = vrot.slane %v320_v24, 9  ;;  %v358_v33 = vmax.f32 %v312_v17, %v839_v29  ;;  %v841_v34 = vrot.slane %v319_v25, 9  ;;  %v321_v35 = vcombine.high %v319_v25, %v319_v25  ;;  %v866_v17 = vld [vmem:[%s1617_s2 + $0x118] sm:$0xff]  ;;  %v885_v29 = vld [vmem:[%s1617_s2 + $0x1a8] sm:$0xff] }
  0xf1   :  { %v354_v26 = vmax.f32 %v295_v19, %v835_v22  ;;  %v836_v28 = vrot.slane %v303_v23, 9  ;;  %v837_v37 = vrot.slane %v302_v30, 9  ;;  %v304_v38 = vcombine.high %v302_v30, %v302_v30 }
  0xf2   :  { %v359_v36 = vmax.f32 %v320_v24, %v840_v32  ;;  %v1465_v39 = vmax.f32 %v319_v25, %v841_v34  ;;  %v842_v40 = vrot.slane %v321_v35, 9  ;;  %v1201_v22 = vpack.c.bf16 %v866_v17, %v865_v16  ;;  %v867_v24 = vld [vmem:[%s1617_s2 + $0x120] sm:$0xff]  ;;  %v868_v25 = vld [vmem:[%s1617_s2 + $0x128] sm:$0xff]  ;;  %v869_v32 = vld [vmem:[%s1617_s2 + $0x130] sm:$0xff] }
  0xf3   :  { %370 = vrot.lane.b32.xlu1 %v354_v26, %s1271_s24  ;;  %v355_v31 = vmax.f32 %v303_v23, %v836_v28  ;;  %v1468_v41 = vmax.f32 %v302_v30, %v837_v37  ;;  %v838_v42 = vrot.slane %v304_v38, 9  ;;  %v884_v28 = vld [vmem:[%s1617_s2 + $0x1a0] sm:$0xff]  ;;  %v1204_v30 = vpack.c.bf16 %v868_v25, %v867_v24  ;;  %v887_v37 = vld [vmem:[%s1617_s2 + $0x1b8] sm:$0xff] }
  0xf4   :  { %v1471_v43 = vmax.f32 %v321_v35, %v842_v40  ;;  %v1228_v34 = vpack.c.bf16 %v885_v29, %v884_v28 }
  0xf5   :  { %372 = vrot.lane.b32.xlu0 %v355_v31, %s1271_s24  ;;  %v1474_v44 = vmax.f32 %v304_v38, %v838_v42  ;;  %v871_v42 = vld [vmem:[%s1617_s2 + $0x140] sm:$0xff] }
  0xf7   :  { %378 = vrot.lane.b32.xlu1 %v358_v33, %s1271_s24 }
  0xf9   :  { %380 = vrot.lane.b32.xlu0 %v359_v36, %s1271_s24 }
  0xfb   :  { %382 = vrot.lane.b32.xlu1 %v1465_v39, %s1271_s24 }
  0xfd   :  { %374 = vrot.lane.b32.xlu0 %v1468_v41, %s1271_s24 }
  0xff   :  { %384 = vrot.lane.b32.xlu1 %v1471_v43, %s1271_s24 }
 0x101   :  { %376 = vrot.lane.b32.xlu0 %v1474_v44, %s1271_s24 }
 0x165   :  { %v371_v45 = vpop.permute.xlu1 %370 }
 0x166   :  { %v394_v48 = vmax.f32 %v354_v26, %v371_v45  ;;  %v872_v45 = vld [vmem:[%s1617_s2 + $0x148] sm:$0xff] }
 0x167   :  { %v373_v46 = vpop.permute.xlu0 %372  ;;  %v1210_v51 = vpack.c.bf16 %v872_v45, %v871_v42 }
 0x168   :  { %v395_v52 = vmax.f32 %v355_v31, %v373_v46  ;;  %v521_v57 = vrot.slane %v394_v48, %v1478_v47 }
 0x169   :  { %v379_v49 = vpop.permute.xlu1 %378 }
 0x16a   :  { %v398_v53 = vmax.f32 %v358_v33, %v379_v49  ;;  %v436_v63 = vrot.slane %v395_v52, %v1478_v47  ;;  %v870_v33 = vld [vmem:[%s1617_s2 + $0x138] sm:$0xff] }
 0x16b   :  { %v381_v54 = vpop.permute.xlu0 %380  ;;  %v1207_v40 = vpack.c.bf16 %v870_v33, %v869_v32 }
 0x16c   :  { %v525_v58 = vrot.slane %v398_v53, %v1478_v47  ;;  %v399_v59 = vmax.f32 %v359_v36, %v381_v54  ;;  %v886_v36 = vld [vmem:[%s1617_s2 + $0x1b0] sm:$0xff] }
 0x16d   :  { %v383_v23 = vpop.permute.xlu1 %382  ;;  %v1231_v49 = vpack.c.bf16 %v887_v37, %v886_v36 }
 0x16e   :  { %v440_v0 = vrot.slane %v399_v59, %v1478_v47  ;;  %v526_v1 = vsel %vm441_vm2, %v525_v58, %v521_v57 }
 0x16f   :  { %1061 = vmatmul.mubr.msk.f32.vlgmr.msra.gmra.mrb[2].mxu0 %vm443_vm3, %v526_v1  ;;  %v375_v19 = vpop.permute.xlu0 %374 }
 0x170   :  { %1214 = vmatpush3.bf16.msra.mxu0 %v1213_v60  ;;  %v442_v5 = vsel %vm441_vm2, %v440_v0, %v436_v63  ;;  %1122 = vmatprep.mubr.msk.f32.mxu0 %vm1269_vm1, %v1270_v20  ;;  %v396_v46 = vmax.f32 %v1468_v41, %v375_v19 }
 0x171   :  { %1030 = vmatmul.mubr.msk.f32.vlgmr.msra.gmra.mrb[2].mxu1 %vm443_vm3, %v442_v5  ;;  %1215 = vmatprep.subr.bf16.mxu0 %v1267_v27  ;;  %v385_v35 = vpop.permute.xlu1 %384 }
 0x172   :  { %1193 = vmatpush3.bf16.msra.mxu1 %v1192_v2  ;;  %1091 = vmatprep.mubr.msk.f32.mxu1 %vm1269_vm1, %v1270_v20  ;;  %v882_v20 = vld [vmem:[%s1617_s2 + $0x190] sm:$0xff]  ;;  %v401_v48 = vmax.f32 %v1471_v43, %v385_v35  ;;  %v619_v52 = vrot.slane %v396_v46, %v1478_v47 }
 0x173   :  { %1194 = vmatprep.subr.bf16.mxu1 %v1267_v27  ;;  %v1225_v26 = vpack.c.bf16 %v883_v21, %v882_v20  ;;  %v377_v31 = vpop.permute.xlu0 %376 }
 0x174   :  { %1217 = vmatpush3.bf16.msra.mxu0 %v1216_v6  ;;  %v397_v38 = vmax.f32 %v1474_v44, %v377_v31  ;;  %v400_v44 = vmax.f32 %v1465_v39, %v383_v23  ;;  %v722_v53 = vrot.slane %v401_v48, %v1478_v47 }
 0x175   :  { %1218 = vmatprep.subr.bf16.mxu0 %v1267_v27 }
 0x176   :  { %1196 = vmatpush3.bf16.msra.mxu1 %v1195_v9  ;;  %v718_v50 = vrot.slane %v397_v38, %v1478_v47  ;;  %v623_v41 = vrot.slane %v400_v44, %v1478_v47  ;;  %v889_v47 = vld [vmem:[%s1618_s3] ss:$0 sm:$0xff] }
 0x177   :  { %1197 = vmatprep.subr.bf16.mxu1 %v1267_v27 }
 0x178   :  { %1220 = vmatpush3.bf16.msra.mxu0 %v1219_v12  ;;  %v723_v43 = vsel %vm441_vm2, %v722_v53, %v718_v50  ;;  %v624_v39 = vsel %vm441_vm2, %v623_v41, %v619_v52 }
 0x179   :  { %1221 = vmatprep.subr.bf16.mxu0 %v1267_v27 }
 0x17a   :  { %1199 = vmatpush3.bf16.msra.mxu1 %v1198_v15 }
 0x17b   :  { %1200 = vmatprep.subr.bf16.mxu1 %v1267_v27 }
 0x17c   :  { %1223 = vmatpush3.bf16.msra.mxu0 %v1222_v18 }
 0x17d   :  { %1224 = vmatprep.subr.bf16.mxu0 %v1267_v27 }
 0x17e   :  { %1202 = vmatpush3.bf16.msra.mxu1 %v1201_v22 }
 0x17f   :  { %1203 = vmatprep.subr.bf16.mxu1 %v1267_v27 }
 0x180   :  { %1226 = vmatpush3.bf16.msra.mxu0 %v1225_v26 }
 0x181   :  { %1227 = vmatprep.subr.bf16.mxu0 %v1267_v27 }
 0x182   :  { %1205 = vmatpush3.bf16.msra.mxu1 %v1204_v30 }
 0x183   :  { %1206 = vmatprep.subr.bf16.mxu1 %v1267_v27 }
 0x184   :  { %1229 = vmatpush3.bf16.msra.mxu0 %v1228_v34 }
 0x185   :  { %1230 = vmatprep.subr.bf16.mxu0 %v1267_v27 }
 0x186   :  { %1208 = vmatpush3.bf16.msra.mxu1 %v1207_v40 }
 0x187   :  { %1209 = vmatprep.subr.bf16.mxu1 %v1267_v27 }
 0x188   :  { %1232 = vmatpush3.bf16.msra.mxu0 %v1231_v49 }
 0x18a   :  { %1211 = vmatpush3.bf16.msra.mxu1 %v1210_v51 }
 0x18b   :  { %1123 = vmatmul.mubr.msk.f32.vlgmr.msra.gmra.mrb[4].mxu0 %vm443_vm3, %v723_v43 }
 0x18d   :  { %1092 = vmatmul.mubr.msk.f32.vlgmr.msra.gmra.mrb[4].mxu1 %vm443_vm3, %v624_v39 }
 0x242   :  { %v595_v54 = vpop.f32.mrb[2].mxu0 }
 0x243   :  { %v1062_v55 = vpop.f32.mrb[3].mxu0 }
 0x244   :  { %v512_v56 = vpop.f32.mrb[2].mxu1 }
 0x245   :  { %v596_v27 = vadd.f32 %v595_v54, %v512_v56  ;;  %v1031_v57 = vpop.f32.mrb[3].mxu1 }
 0x25e   :  { %v792_v58 = vpop.f32.mrb[4].mxu0 }
 0x25f   :  { %v1124_v59 = vpop.f32.mrb[5].mxu0 }
 0x260   :  { %v693_v60 = vpop.f32.mrb[4].mxu1 }
 0x261   :  { %v697_v61 = vadd.f32 %v693_v60, %v596_v27  ;;  %v1093_v62 = vpop.f32.mrb[5].mxu1 }
 0x263   :  { %v796_v63 = vadd.f32 %v792_v58, %v697_v61 }
 0x265   :  { %v804_v0 = vadd.f32 %v889_v47, %v796_v63 }
 0x267   :  { %806 = vst.msk [vmem:[#allocation2] sm:$0x3] %vm805_vm4, %v804_v0 }
 0x268   :  { %1254 = shalt.err (!%p1251_p4)
}
 0x269   :  { %s1255_s30 = scalar_lea.hbm %s1619_s4, 32 }
 0x26a   :  { %p1256_p5 = scmp.ne.s32.totalorder %s1619_s4, %s1255_s30  ;;  %p1259_p6 = scmp.lt.u32.totalorder %s1255_s30, %s1619_s4 }
 0x26c   :  { %p1261_p7 = pnand %p1259_p6, %p1256_p5 }
 0x26e   :  { %1264 = shalt.err (!%p1261_p7)
}
 0x26f   :  { %816 = dma.vmem_to_hbm [thread:$0]  %s814_s27, 32, %s1619_s4, [#allocation3]  }
 0x270   :  { %1265 = dma.done.wait [#allocation3], 32  }
 0x271   :  { %1266 = vsyncadd [#allocation3], 4294967264 }
 0x272   :  { %820 = vsyncpa [#allocation3], 1 }

</bundles_post_ra>
